<compile_context>
chip_gen: v7x
topology: tpu7x:2x2x1
jax: 0.10.0
libtpu: 0.0.40
codegen_flags: <defaults>
</compile_context>

<pallas_src>
import math

import jax
import jax.numpy as jnp
from jax import lax
from jax.experimental import pallas as pl
from jax.experimental.pallas import tpu as pltpu

_LANE = 128
_SUBLANE = 8


def _round_up(n, m):
    return ((n + m - 1) // m) * m


def _resident_spec(shape, index_map):
    """BlockSpec for an operand fetched once (constant block index).

    Single-buffered when this JAX supports pipeline_mode (default double
    buffering would just double its resident VMEM for zero benefit).
    """
    try:
        return pl.BlockSpec(shape, index_map, pipeline_mode=pl.Buffered(1))
    except TypeError:  # older BlockSpec without pipeline_mode kwarg
        return pl.BlockSpec(shape, index_map)


# ----------------------------- fused Pallas kernel ---------------------------

def _make_mlp_kernel(n_layers, has_ln, dims_true, dims_pad, eps, manual_w):
    """Fully fused MLP kernel.

    Ref layout:
      inputs : (x, w_0..w_{L-1}, [ln_slab])
      outputs: (out,)
      scratch: (w_vmem_0..w_vmem_{L-1}, dma_sem)   # manual_w path only
    All feature dims are padded to multiples of 128 (lane dense). Padded weight /
    gamma / beta entries are zero so padded activation lanes stay exactly zero.
    """

    def kernel(*refs):
        x_ref = refs[0]
        w_refs = refs[1:1 + n_layers]
        pos = 1 + n_layers
        ln_ref = refs[pos] if has_ln else None
        pos += 1 if has_ln else 0
        o_ref = refs[pos]
        pos += 1

        if manual_w:
            w_vmem = refs[pos:pos + n_layers]
            sem = refs[pos + n_layers]

            def wcopy(i):
                return pltpu.make_async_copy(w_refs[i], w_vmem[i], sem.at[i])

            # Fire every weight DMA immediately; each is waited on only right
            # before its own matmul -> later layers' loads hide under compute.
            for i in range(n_layers):
                wcopy(i).start()

        x = x_ref[...].astype(jnp.float32)
        for i in range(n_layers):
            if manual_w:
                wcopy(i).wait()
                w = w_vmem[i][...]          # bf16
            else:
                w = w_refs[i][...]          # bf16
            # bf16 MXU inputs, f32 accumulation.
            y = jnp.dot(x.astype(jnp.bfloat16), w,
                        preferred_element_type=jnp.float32)
            if i < n_layers - 1:
                y = jnp.maximum(y, 0.0)                       # fused ReLU
                if has_ln:
                    d = dims_true[i + 1]
                    dp = dims_pad[i + 1]
                    inv_d = jnp.float32(1.0 / d)
                    # padded lanes of y are exactly 0 -> sum over dp is exact
                    mean = jnp.sum(y, axis=-1, keepdims=True) * inv_d
                    yc = y - mean
                    if dp > d:
                        # exclude padded lanes ((0-mean)^2 != 0) from variance
                        mask = (lax.broadcasted_iota(jnp.int32, (1, dp), 1)
                                < d).astype(jnp.float32)
                        yc_m = yc * mask
                    else:
                        yc_m = yc
                    # two-pass variance: no E[x^2]-E[x]^2 cancellation
                    var = jnp.sum(yc_m * yc_m, axis=-1, keepdims=True) * inv_d
                    g = ln_ref[2 * i:2 * i + 1, :dp]          # gamma (zero-padded)
                    b = ln_ref[2 * i + 1:2 * i + 2, :dp]      # beta  (zero-padded)
                    # padded lanes: gamma = beta = 0  ->  output lane stays 0
                    y = yc * lax.rsqrt(var + eps) * g + b
            x = y
        o_ref[...] = x.astype(o_ref.dtype)

    return kernel


# ------------------------------- JAX wrapper ---------------------------------

def mlp_forward_pallas(x, weights_p, ln_slab, dims_true, dims_pad, eps=1e-5):
    """Run the fused MLP kernel on lane-dense (128-padded) bf16 weights."""
    B = x.shape[0]
    n_layers = len(weights_p)
    has_ln = ln_slab is not None
    din_p, dout_p = dims_pad[0], dims_pad[-1]

    # ---- batch tiling ---------------------------------------------------
    b8 = _round_up(max(B, 1), _SUBLANE)
    if b8 <= _SUBLANE:
        tb = b8                                    # one tiny block
    elif b8 <= 512:
        tb = _round_up((b8 + 1) // 2, _SUBLANE)    # 2 parallel blocks (v7x 2 TCs)
    else:
        tb = 256                                   # amortize per-step overhead
    nb = pl.cdiv(B, tb)
    b_pad = nb * tb

    x_p = jnp.zeros((b_pad, din_p), jnp.float32).at[:B, :dims_true[0]].set(
        x.astype(jnp.float32))

    # Single batch block: no grid reuse of resident weights anyway, so overlap
    # the weight DMAs with compute via manual copies.
    manual_w = (nb == 1)
    kernel = _make_mlp_kernel(n_layers, has_ln, dims_true, dims_pad, eps, manual_w)

    in_specs = [pl.BlockSpec((tb, din_p), lambda i: (i, 0))]
    inputs = [x_p]
    scratch = []
    for w in weights_p:
        if manual_w:
            in_specs.append(pl.BlockSpec(memory_space=pl.ANY))
            scratch.append(pltpu.VMEM(w.shape, w.dtype))
        else:
            in_specs.append(_resident_spec(w.shape, lambda i: (0, 0)))
        inputs.append(w)
    if manual_w:
        scratch.append(pltpu.SemaphoreType.DMA((n_layers,)))
    if has_ln:
        in_specs.append(_resident_spec(ln_slab.shape, lambda i: (0, 0)))
        inputs.append(ln_slab)

    # ---- explicit VMEM budget (resident bf16 weights + tiles + headroom) ----
    w_bytes = sum(int(w.size) * 2 for w in weights_p)
    max_dp = max(dims_pad)
    act_bytes = 6 * tb * max_dp * 4
    io_bytes = 2 * tb * (din_p + dout_p) * 4
    ln_bytes = int(ln_slab.size) * 4 if has_ln else 0
    vmem_limit = int(1.5 * (2 * w_bytes + act_bytes + io_bytes + ln_bytes)) + (2 << 20)
    vmem_limit = min(max(vmem_limit, 32 << 20), 64 << 20)   # 64 MiB = v7x physical

    out_p = pl.pallas_call(
        kernel,
        out_shape=jax.ShapeDtypeStruct((b_pad, dout_p), jnp.float32),
        grid=(nb,),
        in_specs=in_specs,
        out_specs=pl.BlockSpec((tb, dout_p), lambda i: (i, 0)),
        scratch_shapes=scratch,
        compiler_params=pltpu.CompilerParams(
            dimension_semantics=("arbitrary",) if manual_w else ("parallel",),
            vmem_limit_bytes=vmem_limit),
    )(*inputs)

    return out_p[:B, :dims_true[-1]]


# ------------------------------- MLP module ----------------------------------

class MLPPallas:
    """Pallas port of opennre MLP (eval mode), fully fused forward pass."""

    def __init__(self, input_sizes, key, dropout_prob=0.2, bias=False):
        assert not bias, "module is constructed with bias=False"
        # TODO(synk): dropout is identity in eval mode; training-mode dropout
        # (torch RNG semantics) is not reproduced here.
        del dropout_prob
        self.input_sizes = tuple(input_sizes)
        self.dims_true = tuple(input_sizes)
        self.dims_pad = tuple(_round_up(d, _LANE) for d in input_sizes)
        self.eps = 1e-5

        n_layers = len(input_sizes) - 1
        keys = jax.random.split(key, n_layers)

        self.weights = []           # f32, true shapes (reference)
        self.weights_padded = []    # bf16, lane-dense zero-padded (kernel / MXU)
        for i in range(1, len(input_sizes)):
            fan_in, fan_out = input_sizes[i - 1], input_sizes[i]
            bound = 1.0 / math.sqrt(fan_in)   # torch nn.Linear default init range
            w = jax.random.uniform(keys[i - 1], (fan_in, fan_out), jnp.float32,
                                   -bound, bound)
            self.weights.append(w)
            fi_p, fo_p = self.dims_pad[i - 1], self.dims_pad[i]
            w_p = jnp.zeros((fi_p, fo_p), jnp.bfloat16)
            w_p = w_p.at[:fan_in, :fan_out].set(w.astype(jnp.bfloat16))
            self.weights_padded.append(w_p)

        # All LayerNorm params in one slab: row 2*i = gamma_i, row 2*i+1 = beta_i.
        # torch defaults gamma=1, beta=0; padded columns are zero so padded
        # activation lanes stay exactly zero after the LN epilogue.
        self.ln_slab = None
        if len(input_sizes) > 2:
            d_max_p = max(self.dims_pad[1:-1])
            n_ln = len(input_sizes) - 2
            slab = jnp.zeros((2 * n_ln, d_max_p), jnp.float32)
            for i in range(n_ln):
                slab = slab.at[2 * i, :input_sizes[i + 1]].set(1.0)
            self.ln_slab = slab

    def __call__(self, x):
        return mlp_forward_pallas(x, self.weights_padded, self.ln_slab,
                                  self.dims_true, self.dims_pad, self.eps)

    # pure-f32 mirror of the torch module (eval mode, gamma=1 / beta=0)
    def reference_f32(self, x):
        n = len(self.weights)
        x = x.astype(jnp.float32)
        for i, w in enumerate(self.weights):
            x = x @ w
            if i < n - 1:
                x = jnp.maximum(x, 0.0)
                if self.ln_slab is not None:
                    mean = jnp.mean(x, axis=-1, keepdims=True)
                    var = jnp.mean((x - mean) ** 2, axis=-1, keepdims=True)
                    x = (x - mean) / jnp.sqrt(var + self.eps)
        return x

    # mirror of the kernel's numerics (bf16 matmul inputs, f32 accumulation/LN)
    def reference_kernel_numerics(self, x):
        n = len(self.weights)
        x = x.astype(jnp.float32)
        for i, w in enumerate(self.weights):
            y = jnp.dot(x.astype(jnp.bfloat16), w.astype(jnp.bfloat16),
                        preferred_element_type=jnp.float32)
            if i < n - 1:
                y = jnp.maximum(y, 0.0)
                if self.ln_slab is not None:
                    d = self.dims_true[i + 1]
                    inv_d = jnp.float32(1.0 / d)
                    mean = jnp.sum(y, axis=-1, keepdims=True) * inv_d
                    yc = y - mean
                    var = jnp.sum(yc * yc, axis=-1, keepdims=True) * inv_d
                    y = yc * lax.rsqrt(var + self.eps)   # gamma=1, beta=0
            x = y
        return x


# --------------------------------- driver ------------------------------------

if __name__ == "__main__":
    key = jax.random.PRNGKey(0)
    k_param, k_x1, k_x2 = jax.random.split(key, 3)

    input_sizes = (32, 64, 128, 16)   # two hidden layers -> ReLU + LayerNorm applied
    mlp = MLPPallas(input_sizes, k_param)

    # small batch -> single grid block -> manual weight-DMA-overlap path
    x1 = jax.random.normal(k_x1, (8, input_sizes[0]), jnp.float32)
    out1 = jax.block_until_ready(mlp(x1))
    assert out1.shape == (8, input_sizes[-1]), out1.shape
    assert jnp.allclose(out1, mlp.reference_kernel_numerics(x1),
                        atol=1e-4, rtol=1e-4), "mismatch vs matched-numerics ref"
    assert jnp.allclose(out1, mlp.reference_f32(x1),
                        atol=5e-2, rtol=5e-2), "mismatch vs f32 reference"

    # larger batch -> 2 parallel grid blocks (megacore path), resident weights
    x2 = jax.random.normal(k_x2, (40, input_sizes[0]), jnp.float32)
    out2 = jax.block_until_ready(mlp(x2))
    assert out2.shape == (40, input_sizes[-1]), out2.shape
    assert jnp.allclose(out2, mlp.reference_kernel_numerics(x2),
                        atol=1e-4, rtol=1e-4), "mismatch vs matched-numerics ref"

    print("KERNEL_OK")
</pallas_src>

<mosaic_0001>
module attributes {stable_mosaic.version = 11 : i64} {
  func.func @kernel(%arg0: i32, %arg1: memref<8x128xf32, #tpu.memory_space<vmem>>, %arg2: memref<128x128xbf16, #tpu.memory_space<any>>, %arg3: memref<128x128xbf16, #tpu.memory_space<any>>, %arg4: memref<128x128xbf16, #tpu.memory_space<any>>, %arg5: memref<4x128xf32, #tpu.memory_space<vmem>>, %arg6: memref<8x128xf32, #tpu.memory_space<vmem>>, %arg7: memref<128x128xbf16, #tpu.memory_space<vmem>>, %arg8: memref<128x128xbf16, #tpu.memory_space<vmem>>, %arg9: memref<128x128xbf16, #tpu.memory_space<vmem>>, %arg10: memref<3x!tpu.dma_semaphore, #tpu.memory_space<semaphore_mem>>) attributes {dimension_semantics = [#tpu.dimension_semantics<arbitrary>], iteration_bounds = array<i64: 1>, scalar_prefetch = 0 : i64, scratch_operands = 4 : i64, tpu.core_type = #tpu.core_type<tc>, window_params = [{transform_indices = @transform_0, window_bounds = array<i64: 8, 128>}, {}, {}, {}, {pipeline_mode = #tpu.pipeline_mode<synchronous>, transform_indices = @transform_4, window_bounds = array<i64: 4, 128>}, {transform_indices = @transform_5, window_bounds = array<i64: 8, 128>}]} {
    %c0_i32 = arith.constant 0 : i32
    %0 = tpu.memref_slice %arg10[%c0_i32] : memref<3x!tpu.dma_semaphore, #tpu.memory_space<semaphore_mem>> -> memref<1x!tpu.dma_semaphore, #tpu.memory_space<semaphore_mem>>
    %1 = tpu.memref_squeeze %0 : memref<1x!tpu.dma_semaphore, #tpu.memory_space<semaphore_mem>> -> memref<!tpu.dma_semaphore, #tpu.memory_space<semaphore_mem>>
    tpu.enqueue_dma source(%arg2 : memref<128x128xbf16, #tpu.memory_space<any>>) target(%arg7 : memref<128x128xbf16, #tpu.memory_space<vmem>>) target_semaphore(%1 : memref<!tpu.dma_semaphore, #tpu.memory_space<semaphore_mem>>)
    %c1_i32 = arith.constant 1 : i32
    %2 = tpu.memref_slice %arg10[%c1_i32] : memref<3x!tpu.dma_semaphore, #tpu.memory_space<semaphore_mem>> -> memref<1x!tpu.dma_semaphore, #tpu.memory_space<semaphore_mem>>
    %3 = tpu.memref_squeeze %2 : memref<1x!tpu.dma_semaphore, #tpu.memory_space<semaphore_mem>> -> memref<!tpu.dma_semaphore, #tpu.memory_space<semaphore_mem>>
    tpu.enqueue_dma source(%arg3 : memref<128x128xbf16, #tpu.memory_space<any>>) target(%arg8 : memref<128x128xbf16, #tpu.memory_space<vmem>>) target_semaphore(%3 : memref<!tpu.dma_semaphore, #tpu.memory_space<semaphore_mem>>)
    %c2_i32 = arith.constant 2 : i32
    %4 = tpu.memref_slice %arg10[%c2_i32] : memref<3x!tpu.dma_semaphore, #tpu.memory_space<semaphore_mem>> -> memref<1x!tpu.dma_semaphore, #tpu.memory_space<semaphore_mem>>
    %5 = tpu.memref_squeeze %4 : memref<1x!tpu.dma_semaphore, #tpu.memory_space<semaphore_mem>> -> memref<!tpu.dma_semaphore, #tpu.memory_space<semaphore_mem>>
    tpu.enqueue_dma source(%arg4 : memref<128x128xbf16, #tpu.memory_space<any>>) target(%arg9 : memref<128x128xbf16, #tpu.memory_space<vmem>>) target_semaphore(%5 : memref<!tpu.dma_semaphore, #tpu.memory_space<semaphore_mem>>)
    %c0 = arith.constant 0 : index
    %c0_0 = arith.constant 0 : index
    %6 = vector.load %arg1[%c0, %c0_0] : memref<8x128xf32, #tpu.memory_space<vmem>>, vector<8x128xf32>
    %c0_i32_1 = arith.constant 0 : i32
    %7 = tpu.memref_slice %arg10[%c0_i32_1] : memref<3x!tpu.dma_semaphore, #tpu.memory_space<semaphore_mem>> -> memref<1x!tpu.dma_semaphore, #tpu.memory_space<semaphore_mem>>
    %8 = tpu.memref_squeeze %7 : memref<1x!tpu.dma_semaphore, #tpu.memory_space<semaphore_mem>> -> memref<!tpu.dma_semaphore, #tpu.memory_space<semaphore_mem>>
    tpu.wait_dma2 semaphore(%8 : memref<!tpu.dma_semaphore, #tpu.memory_space<semaphore_mem>>) src(%arg2 : memref<128x128xbf16, #tpu.memory_space<any>>) dst(%arg7 : memref<128x128xbf16, #tpu.memory_space<vmem>>)
    %c0_2 = arith.constant 0 : index
    %c0_3 = arith.constant 0 : index
    %9 = vector.load %arg7[%c0_2, %c0_3] : memref<128x128xbf16, #tpu.memory_space<vmem>>, vector<128x128xbf16>
    %10 = arith.truncf %6 : vector<8x128xf32> to vector<8x128xbf16>
    %cst = arith.constant dense<0.000000e+00> : vector<8x128xf32>
    %11 = tpu.matmul %10, %9, %cst {dimension_numbers = #tpu.dot_dimension_numbers<[1], [0], [0], [1], [0, 0, 1, 1], [], []>} : vector<8x128xbf16>, vector<128x128xbf16>, vector<8x128xf32> -> vector<8x128xf32>
    %cst_4 = arith.constant 0.000000e+00 : f32
    %12 = vector.broadcast %cst_4 : f32 to vector<8x128xf32>
    %13 = arith.maximumf %11, %12 : vector<8x128xf32>
    %cst_5 = arith.constant dense<0.000000e+00> : vector<8xf32>
    %14 = vector.multi_reduction <add>, %13, %cst_5 [1] : vector<8x128xf32> to vector<8xf32>
    %15 = vector.shape_cast %14 : vector<8xf32> to vector<8x1xf32>
    %cst_6 = arith.constant 1.562500e-02 : f32
    %16 = vector.broadcast %cst_6 : f32 to vector<8x1xf32>
    %17 = arith.mulf %15, %16 : vector<8x1xf32>
    %18 = vector.broadcast %17 : vector<8x1xf32> to vector<8x128xf32>
    %19 = arith.subf %13, %18 : vector<8x128xf32>
    %20 = tpu.iota {dimensions = array<i32: 1>} : vector<1x128xi32>
    %c64_i32 = arith.constant 64 : i32
    %21 = vector.broadcast %c64_i32 : i32 to vector<1x128xi32>
    %22 = arith.cmpi slt, %20, %21 : vector<1x128xi32>
    %23 = arith.extui %22 : vector<1x128xi1> to vector<1x128xi32>
    %24 = arith.sitofp %23 : vector<1x128xi32> to vector<1x128xf32>
    %25 = vector.broadcast %24 : vector<1x128xf32> to vector<8x128xf32>
    %26 = arith.mulf %19, %25 : vector<8x128xf32>
    %27 = arith.mulf %26, %26 : vector<8x128xf32>
    %cst_7 = arith.constant dense<0.000000e+00> : vector<8xf32>
    %28 = vector.multi_reduction <add>, %27, %cst_7 [1] : vector<8x128xf32> to vector<8xf32>
    %29 = vector.shape_cast %28 : vector<8xf32> to vector<8x1xf32>
    %cst_8 = arith.constant 1.562500e-02 : f32
    %30 = vector.broadcast %cst_8 : f32 to vector<8x1xf32>
    %31 = arith.mulf %29, %30 : vector<8x1xf32>
    %c0_9 = arith.constant 0 : index
    %c0_10 = arith.constant 0 : index
    %32 = vector.load %arg5[%c0_9, %c0_10] : memref<4x128xf32, #tpu.memory_space<vmem>>, vector<1x128xf32>
    %c1 = arith.constant 1 : index
    %c0_11 = arith.constant 0 : index
    %33 = vector.load %arg5[%c1, %c0_11] : memref<4x128xf32, #tpu.memory_space<vmem>>, vector<1x128xf32>
    %cst_12 = arith.constant 9.99999974E-6 : f32
    %34 = vector.broadcast %cst_12 : f32 to vector<8x1xf32>
    %35 = arith.addf %31, %34 : vector<8x1xf32>
    %36 = math.rsqrt %35 : vector<8x1xf32>
    %37 = vector.broadcast %36 : vector<8x1xf32> to vector<8x128xf32>
    %38 = arith.mulf %19, %37 : vector<8x128xf32>
    %39 = vector.broadcast %32 : vector<1x128xf32> to vector<8x128xf32>
    %40 = arith.mulf %38, %39 : vector<8x128xf32>
    %41 = vector.broadcast %33 : vector<1x128xf32> to vector<8x128xf32>
    %42 = arith.addf %40, %41 : vector<8x128xf32>
    %c1_i32_13 = arith.constant 1 : i32
    %43 = tpu.memref_slice %arg10[%c1_i32_13] : memref<3x!tpu.dma_semaphore, #tpu.memory_space<semaphore_mem>> -> memref<1x!tpu.dma_semaphore, #tpu.memory_space<semaphore_mem>>
    %44 = tpu.memref_squeeze %43 : memref<1x!tpu.dma_semaphore, #tpu.memory_space<semaphore_mem>> -> memref<!tpu.dma_semaphore, #tpu.memory_space<semaphore_mem>>
    tpu.wait_dma2 semaphore(%44 : memref<!tpu.dma_semaphore, #tpu.memory_space<semaphore_mem>>) src(%arg3 : memref<128x128xbf16, #tpu.memory_space<any>>) dst(%arg8 : memref<128x128xbf16, #tpu.memory_space<vmem>>)
    %c0_14 = arith.constant 0 : index
    %c0_15 = arith.constant 0 : index
    %45 = vector.load %arg8[%c0_14, %c0_15] : memref<128x128xbf16, #tpu.memory_space<vmem>>, vector<128x128xbf16>
    %46 = arith.truncf %42 : vector<8x128xf32> to vector<8x128xbf16>
    %cst_16 = arith.constant dense<0.000000e+00> : vector<8x128xf32>
    %47 = tpu.matmul %46, %45, %cst_16 {dimension_numbers = #tpu.dot_dimension_numbers<[1], [0], [0], [1], [0, 0, 1, 1], [], []>} : vector<8x128xbf16>, vector<128x128xbf16>, vector<8x128xf32> -> vector<8x128xf32>
    %cst_17 = arith.constant 0.000000e+00 : f32
    %48 = vector.broadcast %cst_17 : f32 to vector<8x128xf32>
    %49 = arith.maximumf %47, %48 : vector<8x128xf32>
    %cst_18 = arith.constant dense<0.000000e+00> : vector<8xf32>
    %50 = vector.multi_reduction <add>, %49, %cst_18 [1] : vector<8x128xf32> to vector<8xf32>
    %51 = vector.shape_cast %50 : vector<8xf32> to vector<8x1xf32>
    %cst_19 = arith.constant 7.812500e-03 : f32
    %52 = vector.broadcast %cst_19 : f32 to vector<8x1xf32>
    %53 = arith.mulf %51, %52 : vector<8x1xf32>
    %54 = vector.broadcast %53 : vector<8x1xf32> to vector<8x128xf32>
    %55 = arith.subf %49, %54 : vector<8x128xf32>
    %56 = arith.mulf %55, %55 : vector<8x128xf32>
    %cst_20 = arith.constant dense<0.000000e+00> : vector<8xf32>
    %57 = vector.multi_reduction <add>, %56, %cst_20 [1] : vector<8x128xf32> to vector<8xf32>
    %58 = vector.shape_cast %57 : vector<8xf32> to vector<8x1xf32>
    %cst_21 = arith.constant 7.812500e-03 : f32
    %59 = vector.broadcast %cst_21 : f32 to vector<8x1xf32>
    %60 = arith.mulf %58, %59 : vector<8x1xf32>
    %c2 = arith.constant 2 : index
    %c0_22 = arith.constant 0 : index
    %61 = vector.load %arg5[%c2, %c0_22] : memref<4x128xf32, #tpu.memory_space<vmem>>, vector<1x128xf32>
    %c3 = arith.constant 3 : index
    %c0_23 = arith.constant 0 : index
    %62 = vector.load %arg5[%c3, %c0_23] : memref<4x128xf32, #tpu.memory_space<vmem>>, vector<1x128xf32>
    %cst_24 = arith.constant 9.99999974E-6 : f32
    %63 = vector.broadcast %cst_24 : f32 to vector<8x1xf32>
    %64 = arith.addf %60, %63 : vector<8x1xf32>
    %65 = math.rsqrt %64 : vector<8x1xf32>
    %66 = vector.broadcast %65 : vector<8x1xf32> to vector<8x128xf32>
    %67 = arith.mulf %55, %66 : vector<8x128xf32>
    %68 = vector.broadcast %61 : vector<1x128xf32> to vector<8x128xf32>
    %69 = arith.mulf %67, %68 : vector<8x128xf32>
    %70 = vector.broadcast %62 : vector<1x128xf32> to vector<8x128xf32>
    %71 = arith.addf %69, %70 : vector<8x128xf32>
    %c2_i32_25 = arith.constant 2 : i32
    %72 = tpu.memref_slice %arg10[%c2_i32_25] : memref<3x!tpu.dma_semaphore, #tpu.memory_space<semaphore_mem>> -> memref<1x!tpu.dma_semaphore, #tpu.memory_space<semaphore_mem>>
    %73 = tpu.memref_squeeze %72 : memref<1x!tpu.dma_semaphore, #tpu.memory_space<semaphore_mem>> -> memref<!tpu.dma_semaphore, #tpu.memory_space<semaphore_mem>>
    tpu.wait_dma2 semaphore(%73 : memref<!tpu.dma_semaphore, #tpu.memory_space<semaphore_mem>>) src(%arg4 : memref<128x128xbf16, #tpu.memory_space<any>>) dst(%arg9 : memref<128x128xbf16, #tpu.memory_space<vmem>>)
    %c0_26 = arith.constant 0 : index
    %c0_27 = arith.constant 0 : index
    %74 = vector.load %arg9[%c0_26, %c0_27] : memref<128x128xbf16, #tpu.memory_space<vmem>>, vector<128x128xbf16>
    %75 = arith.truncf %71 : vector<8x128xf32> to vector<8x128xbf16>
    %cst_28 = arith.constant dense<0.000000e+00> : vector<8x128xf32>
    %76 = tpu.matmul %75, %74, %cst_28 {dimension_numbers = #tpu.dot_dimension_numbers<[1], [0], [0], [1], [0, 0, 1, 1], [], []>} : vector<8x128xbf16>, vector<128x128xbf16>, vector<8x128xf32> -> vector<8x128xf32>
    %c0_29 = arith.constant 0 : index
    %c0_30 = arith.constant 0 : index
    %77 = vector.load %arg6[%c0_29, %c0_30] : memref<8x128xf32, #tpu.memory_space<vmem>>, vector<8x128xf32>
    tpu.vector_store %arg6[%c0_29, %c0_30], %76 {strides = array<i32>} : memref<8x128xf32, #tpu.memory_space<vmem>>, vector<8x128xf32>,
    return
  }
  func.func @transform_0(%arg0: i32) -> (i32, i32) {
    %c0_i32 = arith.constant 0 : i32
    %c0_i32_0 = arith.constant 0 : i32
    return %arg0, %c0_i32 : i32, i32
  }
  func.func @transform_4(%arg0: i32) -> (i32, i32) {
    %c0_i32 = arith.constant 0 : i32
    %c0_i32_0 = arith.constant 0 : i32
    %c0_i32_1 = arith.constant 0 : i32
    return %c0_i32, %c0_i32_0 : i32, i32
  }
  func.func @transform_5(%arg0: i32) -> (i32, i32) {
    %c0_i32 = arith.constant 0 : i32
    %c0_i32_0 = arith.constant 0 : i32
    return %arg0, %c0_i32 : i32, i32
  }
}

</mosaic_0001>

<bundles_post_ra>
// kernel: tpu_custom_call.1
= control target key start
LH: loop header
LB: loop body
LE: loop exit
PB: predicated region body
PF: predicated region fallthrough
CT: control target
= control target key end

     0   :  { %10 = vsyncpa [#allocation7], 0  ;;  %s675_s0 = inlined_call_operand.hbm [shape: f32[8,128], index: 0, kind: input, shape index: {}]   ;;  %s676_s1 = inlined_call_operand.hbm [shape: bf16[128,128], index: 1, kind: input, shape index: {}]   ;;  %s677_s2 = inlined_call_operand.hbm [shape: bf16[128,128], index: 2, kind: input, shape index: {}]   ;;  %s678_s3 = inlined_call_operand.hbm [shape: bf16[128,128], index: 3, kind: input, shape index: {}]   ;;  %s679_s4 = inlined_call_operand.vmem [shape: f32[4,128], index: 4, kind: input, shape index: {}]   ;;  %s680_s5 = inlined_call_operand.hbm [shape: f32[8,128], index: 5, kind: output, shape index: {}]  }
   0x1   :  { %11 = vsyncpa [#allocation8], 0  ;;  %s535_s18 = smov [#allocation6]   ;;  %s415_s22 = scalar_lea.hbm %s675_s0, 128 }
   0x2   :  { %s18_s19 = sshll.u32 %s535_s18, 4  ;;  %p416_p0 = scmp.ne.s32.totalorder %s675_s0, %s415_s22  ;;  %s19_s19 = int_to_ptr.vmem [resolvable:$true] %s18_s19 }
   0x3   :  { %p419_p1 = scmp.lt.u32.totalorder %s415_s22, %s675_s0 }
   0x5   :  { %p421_p2 = pnand %p419_p1, %p416_p0 }
   0x7   :  { %424 = shalt.err (!%p421_p2)
}
   0x8   :  { %s425_s27 = scalar_lea.vmem %s19_s19, 128  ;;  %p430_p4 = scmp.lt.s32.totalorder %s19_s19, %s19_s19 }
   0x9   :  { %p426_p3 = scmp.ne.s32.totalorder %s19_s19, %s425_s27  ;;  %p431_p5 = scmp.lt.s32.totalorder %s425_s27, %s425_s27 }
   0xb   :  { %p432_p6 = por %p431_p5, %p430_p4 }
   0xd   :  { %p433_p7 = pnand %p432_p6, %p426_p3 }
   0xf   :  { %436 = shalt.err (!%p433_p7)
}
  0x10   :  { %21 = dma.hbm_to_vmem [thread:$0]  %s675_s0, 128, %s19_s19, [#allocation7]  }
  0x11   :  { %525 = dma.done.wait [#allocation7], 128  }
  0x12   :  { %526 = vsyncadd [#allocation7], 4294967168  ;;  %s536_s30 = smov [#allocation2]   ;;  %s537_s7 = smov [#allocation3]  }
  0x13   :  { %s35_s6 = sshll.u32 %s536_s30, 4  ;;  %s47_s8 = sshll.u32 %s537_s7, 4  ;;  %s36_s6 = int_to_ptr.vmem [resolvable:$true] %s35_s6  ;;  %s48_s8 = int_to_ptr.vmem [resolvable:$true] %s47_s8 }
  0x14   :  { %s437_s11 = scalar_lea.hbm %s676_s1, 1024 }
  0x15   :  { %p438_p8 = scmp.ne.s32.totalorder %s676_s1, %s437_s11  ;;  %p441_p9 = scmp.lt.u32.totalorder %s437_s11, %s676_s1 }
  0x17   :  { %p443_p10 = pnand %p441_p9, %p438_p8 }
  0x19   :  { %446 = shalt.err (!%p443_p10)  }
  0x1a   :  { %s447_s0 = scalar_lea.vmem %s36_s6, 1024  ;;  %p452_p12 = scmp.lt.s32.totalorder %s36_s6, %s36_s6 }
  0x1b   :  { %p448_p11 = scmp.ne.s32.totalorder %s36_s6, %s447_s0  ;;  %p453_p13 = scmp.lt.s32.totalorder %s447_s0, %s447_s0 }
  0x1d   :  { %p454_p0 = por %p453_p13, %p452_p12 }
  0x1f   :  { %p455_p1 = pnand %p454_p0, %p448_p11 }
  0x21   :  { %458 = shalt.err (!%p455_p1)  }
  0x22   :  { %38 = dma.hbm_to_vmem [thread:$0]  %s676_s1, 1024, %s36_s6, [#allocation5] }
  0x23   :  { %s459_s20 = scalar_lea.hbm %s677_s2, 1024 }
  0x24   :  { %p460_p2 = scmp.ne.s32.totalorder %s677_s2, %s459_s20  ;;  %p463_p3 = scmp.lt.u32.totalorder %s459_s20, %s677_s2 }
  0x26   :  { %p465_p4 = pnand %p463_p3, %p460_p2 }
  0x28   :  { %468 = shalt.err (!%p465_p4)  }
  0x29   :  { %s469_s25 = scalar_lea.vmem %s48_s8, 1024  ;;  %p474_p6 = scmp.lt.s32.totalorder %s48_s8, %s48_s8 }
  0x2a   :  { %p470_p5 = scmp.ne.s32.totalorder %s48_s8, %s469_s25  ;;  %p475_p7 = scmp.lt.s32.totalorder %s469_s25, %s469_s25 }
  0x2c   :  { %p476_p8 = por %p475_p7, %p474_p6 }
  0x2e   :  { %p477_p9 = pnand %p476_p8, %p470_p5 }
  0x30   :  { %480 = shalt.err (!%p477_p9)  }
  0x31   :  { %50 = dma.hbm_to_vmem [thread:$0]  %s677_s2, 1024, %s48_s8, [#allocation5 + $0x1]  ;;  %v63_v0 = vld [vmem:[#allocation6] sm:$0xff] }
  0x32   :  { %s538_s27 = smov [#allocation4]   ;;  %s481_s6 = scalar_lea.hbm %s678_s3, 1024 }
  0x33   :  { %s59_s28 = sshll.u32 %s538_s27, 4  ;;  %p482_p10 = scmp.ne.s32.totalorder %s678_s3, %s481_s6  ;;  %s60_s28 = int_to_ptr.vmem [resolvable:$true] %s59_s28 }
  0x34   :  { %p485_p11 = scmp.lt.u32.totalorder %s481_s6, %s678_s3 }
  0x36   :  { %p487_p12 = pnand %p485_p11, %p482_p10 }
  0x38   :  { %490 = shalt.err (!%p487_p12)  }
  0x39   :  { %s491_s12 = scalar_lea.vmem %s60_s28, 1024  ;;  %p496_p0 = scmp.lt.s32.totalorder %s60_s28, %s60_s28 }
  0x3a   :  { %p492_p13 = scmp.ne.s32.totalorder %s60_s28, %s491_s12  ;;  %p497_p1 = scmp.lt.s32.totalorder %s491_s12, %s491_s12 }
  0x3c   :  { %p498_p2 = por %p497_p1, %p496_p0 }
  0x3e   :  { %p499_p3 = pnand %p498_p2, %p492_p13 }
  0x40   :  { %502 = shalt.err (!%p499_p3)  }
  0x41   :  { %62 = dma.hbm_to_vmem [thread:$0]  %s678_s3, 1024, %s60_s28, [#allocation5 + $0x2] }
  0x42   :  { %527 = dma.done.wait [#allocation5], 1024 }
  0x43   :  { %528 = vsyncadd [#allocation5], 4294966272  ;;  %v539_v1 = vmov 0.0   ;;  %vm540_vm0 = vmmov 0   ;;  %v68_v2 = vld [vmem:[#allocation2] sm:$0xff]  ;;  %v69_v3 = vld [vmem:[#allocation2 + $0x8] sm:$0xff]  ;;  %v76_v10 = vpack.c.bf16 %v63_v0, %v63_v0  ;;  %v122_v16 = vlaneseq }
  0x44   :  { %344 = vmatprep.subr.bf16.mxu0 %v539_v1  ;;  %360 = vmatprep.mubr.msk.bf16.mxu0 %vm540_vm0, %v539_v1  ;;  %v70_v4 = vld [vmem:[#allocation2 + $0x10] sm:$0xff]  ;;  %v71_v5 = vld [vmem:[#allocation2 + $0x18] sm:$0xff]  ;;  %v72_v6 = vld [vmem:[#allocation2 + $0x20] sm:$0xff] }
  0x45   :  { %345 = vmatpush3.bf16.msra.mxu0 %v68_v2  ;;  %v73_v7 = vld [vmem:[#allocation2 + $0x28] sm:$0xff]  ;;  %v74_v8 = vld [vmem:[#allocation2 + $0x30] sm:$0xff]  ;;  %v75_v9 = vld [vmem:[#allocation2 + $0x38] sm:$0xff]  ;;  %v123_v17 = vand.u32 127, %v122_v16 }
  0x46   :  { %346 = vmatprep.subr.bf16.mxu0 %v539_v1  ;;  %v310_v28 = vld [vmem:[%s679_s4] ss:$0 sm:$0xff]  ;;  %v311_v30 = vld [vmem:[%s679_s4 + $0x1] ss:$0 sm:$0xff] }
  0x47   :  { %vm124_vm1 = vcmp.lt.s32.totalorder %v123_v17, 64 }
  0x48   :  { %v309_v20 = vsel %vm124_vm1, 1.0, %v539_v1 }
  0x49   :  { %347 = vmatpush3.bf16.msra.mxu0 %v69_v3 }
  0x4a   :  { %348 = vmatprep.subr.bf16.mxu0 %v539_v1 }
  0x4d   :  { %349 = vmatpush3.bf16.msra.mxu0 %v70_v4 }
  0x4e   :  { %350 = vmatprep.subr.bf16.mxu0 %v539_v1 }
  0x51   :  { %351 = vmatpush3.bf16.msra.mxu0 %v71_v5 }
  0x52   :  { %352 = vmatprep.subr.bf16.mxu0 %v539_v1 }
  0x55   :  { %353 = vmatpush3.bf16.msra.mxu0 %v72_v6 }
  0x56   :  { %354 = vmatprep.subr.bf16.mxu0 %v539_v1 }
  0x59   :  { %355 = vmatpush3.bf16.msra.mxu0 %v73_v7 }
  0x5a   :  { %356 = vmatprep.subr.bf16.mxu0 %v539_v1 }
  0x5d   :  { %357 = vmatpush3.bf16.msra.mxu0 %v74_v8 }
  0x5e   :  { %358 = vmatprep.subr.bf16.mxu0 %v539_v1 }
  0x61   :  { %359 = vmatpush3.bf16.msra.mxu0 %v75_v9 }
  0x64   :  { %361 = vmatmul.mubr.bf16.vlgmr.msra.gmra.mrb[0].mxu0 %v76_v10 }
 0x137   :  { %v111_v11 = vpop.f32.mrb[0].mxu0 }
 0x138   :  { %v117_v12 = vmax.f32 %v111_v11, 0.0  ;;  %v362_v13 = vpop.f32.mrb[1].mxu0 }
 0x139   :  { %v114_v14 = vpop.f32.mrb[2].mxu0 }
 0x13a   :  { %118 = vadd.xlane.f32.xlu0 %v117_v12  ;;  %v363_v15 = vpop.f32.mrb[3].mxu0 }
 0x1c7   :  { %v119_v18 = vpop.xlane.xlu0 %118 }
 0x1c8   :  { %v120_v19 = vmul.f32 0.015625, %v119_v18 }
 0x1ca   :  { %v121_v21 = vsub.f32 %v117_v12, %v120_v19 }
 0x1cc   :  { %v127_v22 = vmul.f32 %v309_v20, %v121_v21 }
 0x1ce   :  { %v128_v23 = vmul.f32 %v127_v22, %v127_v22 }
 0x1d0   :  { %129 = vadd.xlane.f32.xlu0 %v128_v23 }
 0x25d   :  { %v130_v24 = vpop.xlane.xlu0 %129 }
 0x25e   :  { %v131_v25 = vmul.f32 0.015625, %v130_v24 }
 0x260   :  { %v134_v26 = vadd.f32 1e-05, %v131_v25 }
 0x262   :  { %411 = vrsqrt.f32 %v134_v26 }
 0x26c   :  { %v412_v27 = vpop.eup %411 }
 0x26d   :  { %v136_v29 = vmul.f32 %v412_v27, %v121_v21 }
 0x26f   :  { %v141_v31 = vmul.f32 %v310_v28, %v136_v29 }
 0x271   :  { %v146_v32 = vadd.f32 %v311_v30, %v141_v31 }
 0x272   :  { %529 = dma.done.wait [#allocation5 + $0x1], 1024 }
 0x273   :  { %530 = vsyncadd [#allocation5 + $0x1], 4294966272  ;;  %364 = vmatprep.subr.bf16.mxu1 %v539_v1  ;;  %380 = vmatprep.mubr.msk.bf16.mxu1 %vm540_vm0, %v539_v1  ;;  %v149_v33 = vld [vmem:[#allocation3] sm:$0xff]  ;;  %v150_v34 = vld [vmem:[#allocation3 + $0x8] sm:$0xff]  ;;  %v157_v41 = vpack.c.bf16 %v146_v32, %v146_v32 }
 0x274   :  { %365 = vmatpush3.bf16.msra.mxu1 %v149_v33  ;;  %v151_v35 = vld [vmem:[#allocation3 + $0x10] sm:$0xff]  ;;  %v152_v36 = vld [vmem:[#allocation3 + $0x18] sm:$0xff]  ;;  %v153_v37 = vld [vmem:[#allocation3 + $0x20] sm:$0xff] }
 0x275   :  { %366 = vmatprep.subr.bf16.mxu1 %v539_v1  ;;  %v154_v38 = vld [vmem:[#allocation3 + $0x28] sm:$0xff]  ;;  %v155_v39 = vld [vmem:[#allocation3 + $0x30] sm:$0xff]  ;;  %v156_v40 = vld [vmem:[#allocation3 + $0x38] sm:$0xff] }
 0x276   :  { %v312_v55 = vld [vmem:[%s679_s4 + $0x2] ss:$0 sm:$0xff]  ;;  %v313_v57 = vld [vmem:[%s679_s4 + $0x3] ss:$0 sm:$0xff] }
 0x278   :  { %367 = vmatpush3.bf16.msra.mxu1 %v150_v34 }
 0x279   :  { %368 = vmatprep.subr.bf16.mxu1 %v539_v1 }
 0x27c   :  { %369 = vmatpush3.bf16.msra.mxu1 %v151_v35 }
 0x27d   :  { %370 = vmatprep.subr.bf16.mxu1 %v539_v1 }
 0x280   :  { %371 = vmatpush3.bf16.msra.mxu1 %v152_v36 }
 0x281   :  { %372 = vmatprep.subr.bf16.mxu1 %v539_v1 }
 0x284   :  { %373 = vmatpush3.bf16.msra.mxu1 %v153_v37 }
 0x285   :  { %374 = vmatprep.subr.bf16.mxu1 %v539_v1 }
 0x288   :  { %375 = vmatpush3.bf16.msra.mxu1 %v154_v38 }
 0x289   :  { %376 = vmatprep.subr.bf16.mxu1 %v539_v1 }
 0x28c   :  { %377 = vmatpush3.bf16.msra.mxu1 %v155_v39 }
 0x28d   :  { %378 = vmatprep.subr.bf16.mxu1 %v539_v1 }
 0x290   :  { %379 = vmatpush3.bf16.msra.mxu1 %v156_v40 }
 0x293   :  { %381 = vmatmul.mubr.bf16.vlgmr.msra.gmra.mrb[0].mxu1 %v157_v41 }
 0x366   :  { %v192_v42 = vpop.f32.mrb[0].mxu1 }
 0x367   :  { %v198_v43 = vmax.f32 %v192_v42, 0.0  ;;  %v382_v44 = vpop.f32.mrb[1].mxu1 }
 0x368   :  { %v195_v45 = vpop.f32.mrb[2].mxu1 }
 0x369   :  { %199 = vadd.xlane.f32.xlu0 %v198_v43  ;;  %v383_v46 = vpop.f32.mrb[3].mxu1 }
 0x3f6   :  { %v200_v47 = vpop.xlane.xlu0 %199 }
 0x3f7   :  { %v201_v48 = vmul.f32 0.0078125, %v200_v47 }
 0x3f9   :  { %v202_v49 = vsub.f32 %v198_v43, %v201_v48 }
 0x3fb   :  { %v203_v50 = vmul.f32 %v202_v49, %v202_v49 }
 0x3fd   :  { %204 = vadd.xlane.f32.xlu0 %v203_v50 }
 0x48a   :  { %v205_v51 = vpop.xlane.xlu0 %204 }
 0x48b   :  { %v206_v52 = vmul.f32 0.0078125, %v205_v51 }
 0x48d   :  { %v209_v53 = vadd.f32 1e-05, %v206_v52 }
 0x48f   :  { %413 = vrsqrt.f32 %v209_v53 }
 0x499   :  { %v414_v54 = vpop.eup %413 }
 0x49a   :  { %v211_v56 = vmul.f32 %v414_v54, %v202_v49 }
 0x49c   :  { %v216_v58 = vmul.f32 %v312_v55, %v211_v56 }
 0x49e   :  { %v221_v59 = vadd.f32 %v313_v57, %v216_v58 }
 0x49f   :  { %531 = dma.done.wait [#allocation5 + $0x2], 1024 }
 0x4a0   :  { %532 = vsyncadd [#allocation5 + $0x2], 4294966272  ;;  %384 = vmatprep.subr.bf16.mxu0 %v539_v1  ;;  %400 = vmatprep.mubr.msk.bf16.mxu0 %vm540_vm0, %v539_v1  ;;  %v224_v60 = vld [vmem:[#allocation4] sm:$0xff]  ;;  %v225_v61 = vld [vmem:[#allocation4 + $0x8] sm:$0xff]  ;;  %v232_v5 = vpack.c.bf16 %v221_v59, %v221_v59  ;;  %s541_s4 = smov [#allocation9]  }
 0x4a1   :  { %385 = vmatpush3.bf16.msra.mxu0 %v224_v60  ;;  %v226_v62 = vld [vmem:[#allocation4 + $0x10] sm:$0xff]  ;;  %v227_v63 = vld [vmem:[#allocation4 + $0x18] sm:$0xff]  ;;  %v228_v0 = vld [vmem:[#allocation4 + $0x20] sm:$0xff]  ;;  %s280_s19 = sshll.u32 %s541_s4, 4  ;;  %s281_s19 = int_to_ptr.vmem [resolvable:$true] %s280_s19 }
 0x4a2   :  { %386 = vmatprep.subr.bf16.mxu0 %v539_v1  ;;  %v229_v2 = vld [vmem:[#allocation4 + $0x28] sm:$0xff]  ;;  %v230_v3 = vld [vmem:[#allocation4 + $0x30] sm:$0xff]  ;;  %v231_v4 = vld [vmem:[#allocation4 + $0x38] sm:$0xff]  ;;  %s503_s20 = scalar_lea.vmem %s281_s19, 128  ;;  %p508_p5 = scmp.lt.s32.totalorder %s281_s19, %s281_s19 }
 0x4a3   :  { %p504_p4 = scmp.ne.s32.totalorder %s281_s19, %s503_s20  ;;  %p509_p6 = scmp.lt.s32.totalorder %s503_s20, %s503_s20 }
 0x4a5   :  { %387 = vmatpush3.bf16.msra.mxu0 %v225_v61  ;;  %p510_p7 = por %p509_p6, %p508_p5 }
 0x4a6   :  { %388 = vmatprep.subr.bf16.mxu0 %v539_v1 }
 0x4a7   :  { %p511_p8 = pnand %p510_p7, %p504_p4 }
 0x4a9   :  { %389 = vmatpush3.bf16.msra.mxu0 %v226_v62 }
 0x4aa   :  { %390 = vmatprep.subr.bf16.mxu0 %v539_v1 }
 0x4ad   :  { %391 = vmatpush3.bf16.msra.mxu0 %v227_v63 }
 0x4ae   :  { %392 = vmatprep.subr.bf16.mxu0 %v539_v1 }
 0x4b1   :  { %393 = vmatpush3.bf16.msra.mxu0 %v228_v0 }
 0x4b2   :  { %394 = vmatprep.subr.bf16.mxu0 %v539_v1 }
 0x4b5   :  { %395 = vmatpush3.bf16.msra.mxu0 %v229_v2 }
 0x4b6   :  { %396 = vmatprep.subr.bf16.mxu0 %v539_v1 }
 0x4b9   :  { %397 = vmatpush3.bf16.msra.mxu0 %v230_v3 }
 0x4ba   :  { %398 = vmatprep.subr.bf16.mxu0 %v539_v1 }
 0x4bd   :  { %399 = vmatpush3.bf16.msra.mxu0 %v231_v4 }
 0x4c0   :  { %401 = vmatmul.mubr.bf16.vlgmr.msra.gmra.mrb[4].mxu0 %v232_v5 }
 0x593   :  { %v267_v6 = vpop.f32.mrb[4].mxu0 }
 0x594   :  { %273 = vst [vmem:[#allocation9] sm:$0xff] %v267_v6  ;;  %v402_v7 = vpop.f32.mrb[5].mxu0 }
 0x595   :  { %v270_v8 = vpop.f32.mrb[6].mxu0 }
 0x596   :  { %514 = shalt.err (!%p511_p8)
}
 0x597   :  { %s515_s23 = scalar_lea.hbm %s680_s5, 128 }
 0x598   :  { %p516_p9 = scmp.ne.s32.totalorder %s680_s5, %s515_s23  ;;  %p519_p10 = scmp.lt.u32.totalorder %s515_s23, %s680_s5 }
 0x59a   :  { %p521_p11 = pnand %p519_p10, %p516_p9 }
 0x59c   :  { %524 = shalt.err (!%p521_p11)
}
 0x59d   :  { %283 = dma.vmem_to_hbm [thread:$0]  %s281_s19, 128, %s680_s5, [#allocation8]   ;;  %v403_v1 = vpop.f32.mrb[7].mxu0 }
 0x59e   :  { %533 = dma.done.wait [#allocation8], 128  }
 0x59f   :  { %534 = vsyncadd [#allocation8], 4294967168 }
 0x5a0   :  { %287 = vsyncpa [#allocation7], 1 }
 0x5a1   :  { %288 = vsyncpa [#allocation8], 1 }
 0x5a2   :  { %289 = vsyncmov [#allocation5] }
 0x5a5   :  { %s290_s29 = vpop.sfrf %289 }
 0x5a6   :  { %p314_p12 = scmp.ne.s32.totalorder %s290_s29, 0 }
 0x5a8   :  { %294 = shalt.err (%p314_p12)  }
 0x5a9   :  { %296 = vsyncmov [#allocation5 + $0x1] }
 0x5ac   :  { %s297_s30 = vpop.sfrf %296 }
 0x5ad   :  { %p315_p13 = scmp.ne.s32.totalorder %s297_s30, 0 }
 0x5af   :  { %301 = shalt.err (%p315_p13)  }
 0x5b0   :  { %303 = vsyncmov [#allocation5 + $0x2] }
 0x5b3   :  { %s304_s6 = vpop.sfrf %303 }
 0x5b4   :  { %p316_p0 = scmp.ne.s32.totalorder %s304_s6, 0 }
 0x5b6   :  { %308 = shalt.err (%p316_p0)  }

</bundles_post_ra>
